<compile_context>
chip_gen: v7x
topology: tpu7x:2x2x1
jax: 0.10.0
libtpu: 0.0.40
codegen_flags: <defaults>
</compile_context>

<pallas_src>
import jax
import jax.numpy as jnp
from jax.experimental import pallas as pl
from jax.experimental.pallas import tpu as pltpu


def _projector_kernel(x_ref, w_ref, o_ref):
    # x_ref: (TM, H)   w_ref: (H, TN)   o_ref: (TM, TN)
    x = x_ref[...]
    w = w_ref[...]
    # Cast the activation tile to the weight (compute) dtype in VMEM; no-op
    # when dtypes already match.  f32 accumulation on the MXU.
    o_ref[...] = jnp.dot(
        x.astype(w.dtype), w, preferred_element_type=jnp.float32
    ).astype(o_ref.dtype)


def prepare_projector_weight(weight, compute_dtype=jnp.bfloat16):
    """Transpose the nn.Linear weight (P, H) -> (H, P) ONCE at model-load time.

    Defaults to bf16 storage (full MXU throughput on v5e/v6e/v7x, half the
    weight DMA / VMEM).  Pass compute_dtype=jnp.float32 for an exact path.
    """
    w_t = weight.T
    if compute_dtype is not None:
        w_t = w_t.astype(compute_dtype)
    return w_t


def _vmem_capacity_bytes(default=64 * 1024 * 1024):
    try:
        info = pltpu.get_tpu_info()
        cap = getattr(info, "vmem_capacity_bytes", None)
        if cap:
            return int(cap)
    except Exception:
        pass
    return default


def paligemma_multimodal_projector(
    image_features,          # (B, S, H) -- f32 or bf16
    weight_t,                # (H, P)    -- pre-transposed (and pre-cast) weight
    *,
    tm=None,                 # M-tile; auto-selected from VMEM capacity if None
    tn=None,                 # P-tile; auto (full P, or split when M-grid == 1)
    out_dtype=None,          # default: weight dtype (bf16 at real shapes)
):
    B, S, H = image_features.shape
    H_w, P = weight_t.shape
    assert H == H_w, f"hidden-size mismatch: {H} vs {H_w}"

    M = B * S
    out_dtype = out_dtype if out_dtype is not None else weight_t.dtype
    x2d = image_features.reshape(M, H)   # free reshape; NO dtype cast here

    x_bytes = x2d.dtype.itemsize
    w_bytes = weight_t.dtype.itemsize
    o_bytes = jnp.dtype(out_dtype).itemsize

    vmem_cap = _vmem_capacity_bytes()
    big_vmem = vmem_cap >= 96 * 1024 * 1024          # v5e/v6e: 128 MiB; v7x: 64 MiB

    # --- M tiling ------------------------------------------------------------
    if tm is None:
        if big_vmem:
            tm = 2048                                 # v5e / v6e: amortize per-step overhead
        else:
            tm = 1024 if max(x_bytes, w_bytes) <= 2 else 512   # v7x: keep headroom
    tm = min(tm, M)                                   # block == full dim is always legal
    grid_m = pl.cdiv(M, tm)

    # --- P (N) tiling: only needed when the M grid degenerates to one step ----
    if tn is None:
        if grid_m == 1 and P >= 512 and P % 256 == 0:
            tn = min(1024, P // 2)                    # >=2 N tiles: both v7x TCs busy,
        else:                                         # weight DMA overlaps compute
            tn = P
    tn = min(tn, P)
    grid_n = pl.cdiv(P, tn)

    # --- specs ---------------------------------------------------------------
    x_kwargs = {"pipeline_mode": pl.Buffered(1)} if grid_m == 1 else {}
    w_kwargs = {"pipeline_mode": pl.Buffered(1)} if grid_n == 1 else {}

    in_specs = [
        # x: one (TM, H) tile per inner step; constant (hence single-buffered)
        # when there is only one M tile.
        pl.BlockSpec((tm, H), lambda j, i: (i, 0), **x_kwargs),
        # weight: resident in VMEM (single buffer) when not N-tiled; otherwise
        # one (H, TN) slab per outer step, double-buffered.
        pl.BlockSpec((H, tn), lambda j, i: (0, j), **w_kwargs),
    ]
    # Lane-dense output tile (TN is 128-multiple or the full P).
    out_specs = pl.BlockSpec((tm, tn), lambda j, i: (i, j))

    # --- VMEM budget / cost estimate ------------------------------------------
    est = (
        tm * H * x_bytes * (1 if grid_m == 1 else 2)
        + H * tn * w_bytes * (1 if grid_n == 1 else 2)
        + tm * tn * o_bytes * 2
    )
    vmem_limit = int(
        min(
            max(est * 1.25 + (4 << 20), 32 << 20),
            max(vmem_cap - (8 << 20), 32 << 20),
        )
    )

    cost = pl.CostEstimate(
        flops=2 * M * H * P,
        bytes_accessed=M * H * x_bytes + H * P * w_bytes + M * P * o_bytes,
        transcendentals=0,
    )

    out2d = pl.pallas_call(
        _projector_kernel,
        out_shape=jax.ShapeDtypeStruct((M, P), out_dtype),
        grid_spec=pltpu.PrefetchScalarGridSpec(
            num_scalar_prefetch=0,
            grid=(grid_n, grid_m),      # N outermost; both axes independent
            in_specs=in_specs,
            out_specs=out_specs,
        ),
        compiler_params=pltpu.CompilerParams(
            # Independent tiles on both axes: shard across v7x's 2 TensorCores.
            dimension_semantics=("parallel", "parallel"),
            vmem_limit_bytes=vmem_limit,
        ),
        cost_estimate=cost,
    )(x2d, weight_t)

    return out2d.reshape(B, S, P)


if __name__ == "__main__":
    # Small, module-consistent shapes:
    #   vision hidden_size H = 32, projection_dim P = 64
    #   batch B = 2, num_image_tokens S = 8
    B, S, H, P = 2, 8, 32, 64

    key = jax.random.PRNGKey(0)
    k_x, k_w = jax.random.split(key)

    image_features = jax.random.normal(k_x, (B, S, H), dtype=jnp.float32)
    # Deterministic nn.Linear-style init: U(-1/sqrt(H), 1/sqrt(H)), shape (P, H)
    bound = 1.0 / (H ** 0.5)
    weight = jax.random.uniform(
        k_w, (P, H), minval=-bound, maxval=bound, dtype=jnp.float32
    )

    # Pure-JAX reference of the PyTorch forward (x @ W.T).
    ref = jnp.einsum("bsh,ph->bsp", image_features, weight)

    # 1) Exact f32 path — tight tolerance.
    w_f32 = prepare_projector_weight(weight, compute_dtype=jnp.float32)
    out = paligemma_multimodal_projector(
        image_features, w_f32, out_dtype=jnp.float32
    )
    out = jax.block_until_ready(out)
    assert out.shape == (B, S, P)
    assert jnp.allclose(out, ref, atol=1e-5, rtol=1e-5)

    # 2) Recommended default path: bf16 weight storage (cast once at load),
    #    in-kernel bf16 cast of the f32 activations, f32 accumulation,
    #    bf16 output — looser tolerance vs the f32 reference.
    w_bf16 = prepare_projector_weight(weight)             # bf16 by default
    out_bf16 = paligemma_multimodal_projector(image_features, w_bf16)
    out_bf16 = jax.block_until_ready(out_bf16)
    assert out_bf16.shape == (B, S, P)
    assert out_bf16.dtype == jnp.bfloat16
    assert jnp.allclose(out_bf16.astype(jnp.float32), ref, atol=5e-2, rtol=5e-2)

    print("KERNEL_OK")
</pallas_src>

<mosaic_0001>
module attributes {stable_mosaic.version = 11 : i64} {
  func.func @_projector_kernel(%arg0: i32, %arg1: i32, %arg2: memref<16x32xf32, #tpu.memory_space<vmem>>, %arg3: memref<32x64xf32, #tpu.memory_space<vmem>>, %arg4: memref<16x64xf32, #tpu.memory_space<vmem>>) attributes {dimension_semantics = [#tpu.dimension_semantics<parallel>, #tpu.dimension_semantics<parallel>], iteration_bounds = array<i64: 1, 1>, scalar_prefetch = 0 : i64, scratch_operands = 0 : i64, tpu.core_type = #tpu.core_type<tc>, window_params = [{pipeline_mode = #tpu.pipeline_mode<synchronous>, transform_indices = @transform_0, window_bounds = array<i64: 16, 32>}, {pipeline_mode = #tpu.pipeline_mode<synchronous>, transform_indices = @transform_1, window_bounds = array<i64: 32, 64>}, {transform_indices = @transform_2, window_bounds = array<i64: 16, 64>}]} {
    %c0 = arith.constant 0 : index
    %c0_0 = arith.constant 0 : index
    %0 = vector.load %arg2[%c0, %c0_0] : memref<16x32xf32, #tpu.memory_space<vmem>>, vector<16x32xf32>
    %c0_1 = arith.constant 0 : index
    %c0_2 = arith.constant 0 : index
    %1 = vector.load %arg3[%c0_1, %c0_2] : memref<32x64xf32, #tpu.memory_space<vmem>>, vector<32x64xf32>
    %cst = arith.constant dense<0.000000e+00> : vector<16x64xf32>
    %2 = tpu.matmul %0, %1, %cst {dimension_numbers = #tpu.dot_dimension_numbers<[1], [0], [0], [1], [0, 0, 1, 1], [], []>} : vector<16x32xf32>, vector<32x64xf32>, vector<16x64xf32> -> vector<16x64xf32>
    %c0_3 = arith.constant 0 : index
    %c0_4 = arith.constant 0 : index
    %3 = vector.load %arg4[%c0_3, %c0_4] : memref<16x64xf32, #tpu.memory_space<vmem>>, vector<16x64xf32>
    tpu.vector_store %arg4[%c0_3, %c0_4], %2 {strides = array<i32>} : memref<16x64xf32, #tpu.memory_space<vmem>>, vector<16x64xf32>,
    return
  }
  func.func @transform_0(%arg0: i32, %arg1: i32) -> (i32, i32) {
    %c0_i32 = arith.constant 0 : i32
    %c0_i32_0 = arith.constant 0 : i32
    return %arg1, %c0_i32 : i32, i32
  }
  func.func @transform_1(%arg0: i32, %arg1: i32) -> (i32, i32) {
    %c0_i32 = arith.constant 0 : i32
    %c0_i32_0 = arith.constant 0 : i32
    return %c0_i32, %arg0 : i32, i32
  }
  func.func @transform_2(%arg0: i32, %arg1: i32) -> (i32, i32) {
    %c0_i32 = arith.constant 0 : i32
    return %arg1, %arg0 : i32, i32
  }
}

</mosaic_0001>

<bundles_post_ra>
// kernel: tpu_custom_call.1
= control target key start
LH: loop header
LB: loop body
LE: loop exit
PB: predicated region body
PF: predicated region fallthrough
CT: control target
= control target key end

     0   :  { %7 = vsyncpa [#allocation3], 0  ;;  %s318_s0 = inlined_call_operand.hbm [shape: f32[16,32], index: 0, kind: input, shape index: {}]   ;;  %s319_s1 = inlined_call_operand.hbm [shape: f32[32,64], index: 1, kind: input, shape index: {}]   ;;  %s320_s2 = inlined_call_operand.hbm [shape: f32[16,64], index: 2, kind: output, shape index: {}]  }
   0x1   :  { %8 = vsyncpa [#allocation6], 0 }
   0x2   :  { %9 = vsyncpa [#allocation4], 0  ;;  %s253_s9 = smov [#allocation2]   ;;  %s181_s13 = scalar_lea.hbm %s318_s0, 256 }
   0x3   :  { %s15_s10 = sshll.u32 %s253_s9, 4  ;;  %p182_p0 = scmp.ne.s32.totalorder %s318_s0, %s181_s13  ;;  %s16_s10 = int_to_ptr.vmem [resolvable:$true] %s15_s10 }
   0x4   :  { %p185_p1 = scmp.lt.u32.totalorder %s181_s13, %s318_s0 }
   0x6   :  { %p187_p2 = pnand %p185_p1, %p182_p0 }
   0x8   :  { %190 = shalt.err (!%p187_p2)
}
   0x9   :  { %s191_s18 = scalar_lea.vmem %s16_s10, 256  ;;  %p196_p4 = scmp.lt.s32.totalorder %s16_s10, %s16_s10 }
   0xa   :  { %p192_p3 = scmp.ne.s32.totalorder %s16_s10, %s191_s18  ;;  %p197_p5 = scmp.lt.s32.totalorder %s191_s18, %s191_s18 }
   0xc   :  { %p198_p6 = por %p197_p5, %p196_p4 }
   0xe   :  { %p199_p7 = pnand %p198_p6, %p192_p3 }
  0x10   :  { %202 = shalt.err (!%p199_p7)
}
  0x11   :  { %s254_s19 = smov 128   ;;  %s255_s20 = smov 8  }
  0x12   :  { %21 = dma.hbm_to_vmem [thread:$0]  %s318_s0, 256, %s16_s10, [#allocation3], %s254_s19, %s254_s19, %s255_s20  }
  0x13   :  { %s256_s23 = smov [#allocation5]   ;;  %s203_s27 = scalar_lea.hbm %s319_s1, 512 }
  0x14   :  { %s27_s24 = sshll.u32 %s256_s23, 4  ;;  %p204_p8 = scmp.ne.s32.totalorder %s319_s1, %s203_s27  ;;  %s28_s24 = int_to_ptr.vmem [resolvable:$true] %s27_s24 }
  0x15   :  { %p207_p9 = scmp.lt.u32.totalorder %s203_s27, %s319_s1 }
  0x17   :  { %p209_p10 = pnand %p207_p9, %p204_p8 }
  0x19   :  { %212 = shalt.err (!%p209_p10)
}
  0x1a   :  { %s213_s4 = scalar_lea.vmem %s28_s24, 512  ;;  %p218_p12 = scmp.lt.s32.totalorder %s28_s24, %s28_s24 }
  0x1b   :  { %p214_p11 = scmp.ne.s32.totalorder %s28_s24, %s213_s4  ;;  %p219_p13 = scmp.lt.s32.totalorder %s213_s4, %s213_s4 }
  0x1d   :  { %p220_p0 = por %p219_p13, %p218_p12 }
  0x1f   :  { %p221_p1 = pnand %p220_p0, %p214_p11 }
  0x21   :  { %224 = shalt.err (!%p221_p1)
}
  0x22   :  { %33 = dma.hbm_to_vmem [thread:$0]  %s319_s1, 512, %s28_s24, [#allocation6], %s254_s19, %s254_s19, %s255_s20  }
  0x23   :  { %247 = dma.done.wait [#allocation3], 256  }
  0x24   :  { %248 = vsyncadd [#allocation3], 4294967040 }
  0x25   :  { %249 = dma.done.wait [#allocation6], 512  }
  0x26   :  { %250 = vsyncadd [#allocation6], 4294966784  ;;  %vm46_vm0 = vcmask 261120   ;;  %v42_v0 = vld [vmem:[#allocation5] sm:$0xff]  ;;  %v43_v1 = vld [vmem:[#allocation5 + $0x8] sm:$0xff]  ;;  %s257_s1 = smov [#allocation7]  }
  0x27   :  { %v44_v2 = vld [vmem:[#allocation5 + $0x10] sm:$0xff]  ;;  %v168_v3 = vpack.c.bf16 %v43_v1, %v42_v0  ;;  %v45_v4 = vld [vmem:[#allocation5 + $0x18] sm:$0xff]  ;;  %s136_s6 = sshll.u32 %s257_s1, 4  ;;  %vm128_vm1 = vcmask 523264   ;;  %s137_s6 = int_to_ptr.vmem [resolvable:$true] %s136_s6 }
  0x28   :  { %v40_v5 = vld [vmem:[#allocation2] sm:$0xff]  ;;  %v172_v6 = vpack.c.bf16 %v45_v4, %v44_v2  ;;  %v41_v7 = vld [vmem:[#allocation2 + $0x8] sm:$0xff]  ;;  %s225_s7 = scalar_lea.vmem %s137_s6, 256  ;;  %p230_p3 = scmp.lt.s32.totalorder %s137_s6, %s137_s6 }
  0x29   :  { %165 = vmatprep.mubr.msk.f32.mxu0 %vm46_vm0, %v40_v5  ;;  %169 = vmatprep.subr.bf16.mxu0 %v168_v3  ;;  %p226_p2 = scmp.ne.s32.totalorder %s137_s6, %s225_s7  ;;  %p231_p4 = scmp.lt.s32.totalorder %s225_s7, %s225_s7 }
  0x2a   :  { %171 = vmatpush3.bf16.msra.mxu0 %v168_v3 }
  0x2b   :  { %173 = vmatprep.subr.bf16.mxu0 %v172_v6  ;;  %p232_p5 = por %p231_p4, %p230_p3 }
  0x2d   :  { %p233_p6 = pnand %p232_p5, %p226_p2 }
  0x2e   :  { %175 = vmatpush3.bf16.msra.mxu0 %v172_v6 }
  0x31   :  { %166 = vmatmul.mubr.msk.f32.vlgmr.msra.gmra.mrb[0].mxu0 %vm46_vm0, %v41_v7 }
 0x104   :  { %v167_v8 = vpop.f32.mrb[0].mxu0 }
 0x105   :  { %130 = vst.msk [vmem:[#allocation7 + $0x8] sm:$0xff] %vm128_vm1, %v167_v8  ;;  %v119_v9 = vpop.f32.mrb[1].mxu0 }
 0x106   :  { %129 = vst.msk [vmem:[#allocation7] sm:$0xff] %vm128_vm1, %v119_v9 }
 0x107   :  { %236 = shalt.err (!%p233_p6)
}
 0x108   :  { %s237_s10 = scalar_lea.hbm %s320_s2, 256 }
 0x109   :  { %p238_p7 = scmp.ne.s32.totalorder %s320_s2, %s237_s10  ;;  %p241_p8 = scmp.lt.u32.totalorder %s237_s10, %s320_s2 }
 0x10b   :  { %p243_p9 = pnand %p241_p8, %p238_p7 }
 0x10d   :  { %246 = shalt.err (!%p243_p9)
}
 0x10e   :  { %142 = dma.vmem_to_hbm [thread:$0]  %s137_s6, 256, %s320_s2, [#allocation4], %s254_s19, %s254_s19, %s255_s20  }
 0x10f   :  { %251 = dma.done.wait [#allocation4], 256  }
 0x110   :  { %252 = vsyncadd [#allocation4], 4294967040 }
 0x111   :  { %146 = vsyncpa [#allocation3], 1 }
 0x112   :  { %147 = vsyncpa [#allocation6], 1 }
 0x113   :  { %148 = vsyncpa [#allocation4], 1 }

</bundles_post_ra>
